<compile_context>
chip_gen: v6e
topology: v6e:2x2x1
jax: 0.10.0
libtpu: 0.0.40
codegen_flags: <defaults>
</compile_context>

<pallas_src>
import jax
import jax.numpy as jnp
from jax.experimental import pallas as pl
from jax.experimental.pallas import tpu as pltpu


# ----------------------------------------------------------------------------
# tile-size helpers (block dims must be multiples of (8, 128) or the full dim)
# ----------------------------------------------------------------------------
def _row_tile(n, target):
    """Largest multiple of 8 that divides n and is <= target, else n (full)."""
    if n <= target:
        return n
    t = (target // 8) * 8
    while t >= 8:
        if n % t == 0:
            return t
        t -= 8
    return n


def _col_tile(n, target):
    """Largest multiple of 128 that divides n and is <= target, else n (full)."""
    if n <= target:
        return n
    t = (target // 128) * 128
    while t >= 128:
        if n % t == 0:
            return t
        t -= 128
    return n


# ----------------------------------------------------------------------------
# Kernel 1: tiled negative squared pairwise distances
# ----------------------------------------------------------------------------
def _neg_sq_dist_kernel(xq_ref, xk_ref, out_ref):
    xq = xq_ref[...]                                        # (TQ, C)
    xk = xk_ref[...]                                        # (TK, C)
    qn = jnp.sum(xq * xq, axis=-1, keepdims=True)           # (TQ, 1)
    kn = jnp.sum(xk * xk, axis=-1, keepdims=True)           # (TK, 1)
    dots = jnp.dot(xq, xk.T, preferred_element_type=jnp.float32)   # (TQ, TK)
    out_ref[...] = 2.0 * dots - qn - kn.T                   # = -||xq - xk||^2


def neg_sq_dist(pts):
    B, N, C = pts.shape
    tq = _row_tile(N, 256)
    tk = _col_tile(N, 512)
    return pl.pallas_call(
        _neg_sq_dist_kernel,
        out_shape=jax.ShapeDtypeStruct((B, N, N), jnp.float32),
        grid=(B, N // tq, N // tk),
        in_specs=[
            pl.BlockSpec((None, tq, C), lambda b, qi, ki: (b, qi, 0)),
            pl.BlockSpec((None, tk, C), lambda b, qi, ki: (b, ki, 0)),
        ],
        out_specs=pl.BlockSpec((None, tq, tk), lambda b, qi, ki: (b, qi, ki)),
        compiler_params=pltpu.CompilerParams(
            dimension_semantics=("parallel", "parallel", "parallel")),
    )(pts, pts)


def knn_indices(x_t, k):
    B, N, C = x_t.shape
    valid_k = min(k, N - 1)
    negd2 = neg_sq_dist(x_t)                                # (B, N, N)
    # TODO(synk): top-k neighbor selection has no clean Pallas TPU equivalent;
    # kept in JAX (largest of -d^2 == smallest squared distance).
    _, idx = jax.lax.top_k(negd2, valid_k + 1)
    return idx[:, :, 1:]                                    # drop self -> (B, N, k)


# ----------------------------------------------------------------------------
# Kernel 2: BatchNorm statistics pass (partial per-channel sum / sum-of-squares
# of y_ij = x_i @ (W1 - W2) + x_j @ W2, neighbour gather via one-hot matmul)
# ----------------------------------------------------------------------------
def _edge_stats_kernel(xq_ref, xall_ref, idx_ref, wd_ref, w2_ref, stats_ref):
    P = jnp.dot(xall_ref[...], w2_ref[...],
                preferred_element_type=jnp.float32)          # (N, Cp) neighbour table
    A = jnp.dot(xq_ref[...], wd_ref[...],
                preferred_element_type=jnp.float32)          # (TQ, Cp) central term
    idx = idx_ref[...]                                       # (TQ, K) int32
    tq, k = idx.shape
    n = xall_ref.shape[0]
    cp = P.shape[1]
    n_iota = jax.lax.broadcasted_iota(jnp.int32, (tq, n), 1)
    s1 = jnp.zeros((1, cp), jnp.float32)
    s2 = jnp.zeros((1, cp), jnp.float32)
    for kk in range(k):                                      # small static unroll over k
        oh = (idx[:, kk:kk + 1] == n_iota).astype(jnp.float32)          # (TQ, N)
        yk = A + jnp.dot(oh, P, preferred_element_type=jnp.float32)     # (TQ, Cp)
        s1 = s1 + jnp.sum(yk, axis=0, keepdims=True)
        s2 = s2 + jnp.sum(yk * yk, axis=0, keepdims=True)
    stats_ref[0:1, :] = s1
    stats_ref[1:2, :] = s2


def edge_stats(x_t, idx, wd, w2, tq):
    B, N, C = x_t.shape
    K = idx.shape[-1]
    Cp = wd.shape[-1]
    nq = N // tq
    return pl.pallas_call(
        _edge_stats_kernel,
        out_shape=jax.ShapeDtypeStruct((B, nq, 2, Cp), jnp.float32),
        grid=(B, nq),
        in_specs=[
            pl.BlockSpec((None, tq, C), lambda b, q: (b, q, 0)),   # query rows
            pl.BlockSpec((None, N, C), lambda b, q: (b, 0, 0)),    # full per-batch table
            pl.BlockSpec((None, tq, K), lambda b, q: (b, q, 0)),   # neighbour indices
            pl.BlockSpec((C, Cp), lambda b, q: (0, 0)),            # W1 - W2
            pl.BlockSpec((C, Cp), lambda b, q: (0, 0)),            # W2
        ],
        out_specs=pl.BlockSpec((None, None, 2, Cp), lambda b, q: (b, q, 0, 0)),
        compiler_params=pltpu.CompilerParams(
            dimension_semantics=("parallel", "parallel")),
    )(x_t, x_t, idx, wd, w2)


# ----------------------------------------------------------------------------
# Kernel 3: fused projection (BN scale folded into weights) + gather + shift
#           + ReLU + max over k neighbours
# ----------------------------------------------------------------------------
def _edge_out_kernel(xq_ref, xall_ref, idx_ref, wd_ref, w2_ref, shift_ref, out_ref):
    P = jnp.dot(xall_ref[...], w2_ref[...],
                preferred_element_type=jnp.float32)          # (N, Cp), scale pre-folded
    A = jnp.dot(xq_ref[...], wd_ref[...],
                preferred_element_type=jnp.float32) + shift_ref[...]    # (TQ, Cp)
    idx = idx_ref[...]                                       # (TQ, K)
    tq, k = idx.shape
    n = xall_ref.shape[0]
    n_iota = jax.lax.broadcasted_iota(jnp.int32, (tq, n), 1)
    # max_k relu(y_k) == max(0, max_k y_k): start the running max at 0.
    m = jnp.zeros(A.shape, jnp.float32)
    for kk in range(k):
        oh = (idx[:, kk:kk + 1] == n_iota).astype(jnp.float32)
        yk = A + jnp.dot(oh, P, preferred_element_type=jnp.float32)
        m = jnp.maximum(m, yk)
    out_ref[...] = m                                         # (TQ, Cp), lane-dense


def edge_finalize(x_t, idx, wd_s, w2_s, shift, tq):
    B, N, C = x_t.shape
    K = idx.shape[-1]
    Cp = wd_s.shape[-1]
    return pl.pallas_call(
        _edge_out_kernel,
        out_shape=jax.ShapeDtypeStruct((B, N, Cp), jnp.float32),
        grid=(B, N // tq),
        in_specs=[
            pl.BlockSpec((None, tq, C), lambda b, q: (b, q, 0)),
            pl.BlockSpec((None, N, C), lambda b, q: (b, 0, 0)),
            pl.BlockSpec((None, tq, K), lambda b, q: (b, q, 0)),
            pl.BlockSpec((C, Cp), lambda b, q: (0, 0)),
            pl.BlockSpec((C, Cp), lambda b, q: (0, 0)),
            pl.BlockSpec((1, Cp), lambda b, q: (0, 0)),
        ],
        out_specs=pl.BlockSpec((None, tq, Cp), lambda b, q: (b, q, 0)),
        compiler_params=pltpu.CompilerParams(
            dimension_semantics=("parallel", "parallel")),
    )(x_t, x_t, idx, wd_s, w2_s, shift)


# ----------------------------------------------------------------------------
# Full EdgeConv forward
# ----------------------------------------------------------------------------
def edge_conv_forward(x, params, k):
    """x: (B, C, N) float32 -> (B, Cout, N) float32 (matches PyTorch layout)."""
    B, C, N = x.shape
    x_t = jnp.transpose(x, (0, 2, 1)).astype(jnp.float32)    # (B, N, C)
    idx = knn_indices(x_t, k)                                # (B, N, valid_k) int32
    valid_k = idx.shape[-1]

    w = params["w"].astype(jnp.float32)                      # (2C, Cout)
    cout = w.shape[1]
    w1, w2 = w[:C], w[C:]
    wd = w1 - w2
    gamma = params["gamma"].reshape(-1).astype(jnp.float32)
    beta = params["beta"].reshape(-1).astype(jnp.float32)
    # NOTE: the Conv2d bias is exactly cancelled by training-mode BatchNorm mean
    # subtraction, so it is intentionally NOT used in the kernel path.

    # pad channels to a lane-dense multiple of 128 (sliced off at the end)
    cp = ((cout + 127) // 128) * 128
    pad = cp - cout
    wd_p = jnp.pad(wd, ((0, 0), (0, pad)))
    w2_p = jnp.pad(w2, ((0, 0), (0, pad)))
    gamma_p = jnp.pad(gamma, (0, pad))
    beta_p = jnp.pad(beta, (0, pad))

    tq = _row_tile(N, 256)

    # Pass 1: global batch statistics of y (sum / sum-of-squares per channel)
    parts = edge_stats(x_t, idx, wd_p, w2_p, tq)             # (B, N//tq, 2, cp)
    stats = jnp.sum(parts, axis=(0, 1))                      # (2, cp)
    cnt = jnp.float32(B * N * valid_k)
    mean = stats[0] / cnt
    var = jnp.maximum(stats[1] / cnt - mean * mean, 0.0)     # biased var (train BN)
    scale = gamma_p * jax.lax.rsqrt(var + 1e-5)
    shift = beta_p - mean * scale

    # Pass 2: fused projection (scale folded into weights) + gather + ReLU + max_k
    out_p = edge_finalize(x_t, idx, wd_p * scale[None, :], w2_p * scale[None, :],
                          shift.reshape(1, cp), tq)          # (B, N, cp)
    return jnp.transpose(out_p[:, :, :cout], (0, 2, 1))      # (B, Cout, N)


# ----------------------------------------------------------------------------
# Pure-JAX reference (uses the same kNN indices) for a numerical cross-check
# ----------------------------------------------------------------------------
def _reference_from_idx(x, params, idx):
    B, C, N = x.shape
    K = idx.shape[-1]
    x_t = jnp.transpose(x, (0, 2, 1))
    bidx = jnp.arange(B)[:, None, None]
    nb = x_t[bidx, idx]                                      # (B, N, K, C)
    ce = jnp.broadcast_to(x_t[:, :, None, :], (B, N, K, C))
    e = jnp.concatenate([ce, nb - ce], axis=-1)              # (B, N, K, 2C)
    y = jnp.einsum("bnkc,co->bnko", e, params["w"],
                   precision=jax.lax.Precision.HIGHEST) + params["b"]
    mean = y.mean(axis=(0, 1, 2))
    var = ((y - mean) ** 2).mean(axis=(0, 1, 2))
    y = (y - mean) * jax.lax.rsqrt(var + 1e-5) * params["gamma"] + params["beta"]
    y = jnp.maximum(y, 0.0).max(axis=2)                      # (B, N, Cout)
    return jnp.transpose(y, (0, 2, 1))


if __name__ == "__main__":
    # Small deterministic configuration: 3-D points, 16 points, k=4 neighbors.
    B, Cin, N, K, Cout = 2, 3, 16, 4, 32

    key = jax.random.PRNGKey(0)
    kx, kw, kb = jax.random.split(key, 3)

    x = jax.random.normal(kx, (B, Cin, N), dtype=jnp.float32)
    params = {
        "w": 0.1 * jax.random.normal(kw, (2 * Cin, Cout), dtype=jnp.float32),
        "b": 0.1 * jax.random.normal(kb, (Cout,), dtype=jnp.float32),   # no-op under train BN
        "gamma": jnp.ones((Cout,), dtype=jnp.float32),
        "beta": jnp.zeros((Cout,), dtype=jnp.float32),
    }

    out = edge_conv_forward(x, params, K)
    out = jax.block_until_ready(out)
    assert out.shape == (B, Cout, N)

    # Cross-check against the dense pure-JAX reference (same neighbour indices).
    idx = knn_indices(jnp.transpose(x, (0, 2, 1)), K)
    ref = _reference_from_idx(x, params, idx)
    assert jnp.allclose(out, ref, atol=1e-2, rtol=1e-2), float(jnp.abs(out - ref).max())

    print("KERNEL_OK")
</pallas_src>

<mosaic_0001>
module attributes {stable_mosaic.version = 11 : i64} {
  func.func @_neg_sq_dist_kernel(%arg0: i32, %arg1: i32, %arg2: i32, %arg3: memref<1x16x3xf32, #tpu.memory_space<vmem>>, %arg4: memref<1x16x3xf32, #tpu.memory_space<vmem>>, %arg5: memref<1x16x16xf32, #tpu.memory_space<vmem>>) attributes {dimension_semantics = [#tpu.dimension_semantics<parallel>, #tpu.dimension_semantics<parallel>, #tpu.dimension_semantics<parallel>], iteration_bounds = array<i64: 2, 1, 1>, scalar_prefetch = 0 : i64, scratch_operands = 0 : i64, tpu.core_type = #tpu.core_type<tc>, window_params = [{transform_indices = @transform_0, window_bounds = array<i64: 1, 16, 3>}, {transform_indices = @transform_1, window_bounds = array<i64: 1, 16, 3>}, {transform_indices = @transform_2, window_bounds = array<i64: 1, 16, 16>}]} {
    %c0 = arith.constant 0 : index
    %c0_0 = arith.constant 0 : index
    %c0_1 = arith.constant 0 : index
    %0 = vector.load %arg3[%c0, %c0_0, %c0_1] : memref<1x16x3xf32, #tpu.memory_space<vmem>>, vector<1x16x3xf32>
    %1 = vector.shape_cast %0 : vector<1x16x3xf32> to vector<16x3xf32>
    %c0_2 = arith.constant 0 : index
    %c0_3 = arith.constant 0 : index
    %c0_4 = arith.constant 0 : index
    %2 = vector.load %arg4[%c0_2, %c0_3, %c0_4] : memref<1x16x3xf32, #tpu.memory_space<vmem>>, vector<1x16x3xf32>
    %3 = vector.shape_cast %2 : vector<1x16x3xf32> to vector<16x3xf32>
    %4 = arith.mulf %1, %1 : vector<16x3xf32>
    %cst = arith.constant dense<0.000000e+00> : vector<16xf32>
    %5 = vector.multi_reduction <add>, %4, %cst [1] : vector<16x3xf32> to vector<16xf32>
    %6 = vector.shape_cast %5 : vector<16xf32> to vector<16x1xf32>
    %7 = arith.mulf %3, %3 : vector<16x3xf32>
    %cst_5 = arith.constant dense<0.000000e+00> : vector<16xf32>
    %8 = vector.multi_reduction <add>, %7, %cst_5 [1] : vector<16x3xf32> to vector<16xf32>
    %9 = vector.shape_cast %8 : vector<16xf32> to vector<16x1xf32>
    %10 = tpu.transpose %3, [1, 0] : vector<16x3xf32> -> vector<3x16xf32>
    %cst_6 = arith.constant dense<0.000000e+00> : vector<16x16xf32>
    %11 = tpu.matmul %1, %10, %cst_6 {dimension_numbers = #tpu.dot_dimension_numbers<[1], [0], [0], [1], [0, 0, 1, 1], [], []>} : vector<16x3xf32>, vector<3x16xf32>, vector<16x16xf32> -> vector<16x16xf32>
    %cst_7 = arith.constant 2.000000e+00 : f32
    %12 = vector.broadcast %cst_7 : f32 to vector<16x16xf32>
    %13 = arith.mulf %12, %11 : vector<16x16xf32>
    %14 = vector.broadcast %6 : vector<16x1xf32> to vector<16x16xf32>
    %15 = arith.subf %13, %14 : vector<16x16xf32>
    %16 = tpu.transpose %9, [1, 0] : vector<16x1xf32> -> vector<1x16xf32>
    %17 = vector.broadcast %16 : vector<1x16xf32> to vector<16x16xf32>
    %18 = arith.subf %15, %17 : vector<16x16xf32>
    %c0_8 = arith.constant 0 : index
    %c0_9 = arith.constant 0 : index
    %c0_10 = arith.constant 0 : index
    %19 = vector.load %arg5[%c0_8, %c0_9, %c0_10] : memref<1x16x16xf32, #tpu.memory_space<vmem>>, vector<1x16x16xf32>
    %20 = vector.shape_cast %19 : vector<1x16x16xf32> to vector<16x16xf32>
    %21 = vector.shape_cast %18 : vector<16x16xf32> to vector<1x16x16xf32>
    tpu.vector_store %arg5[%c0_8, %c0_9, %c0_10], %21 {strides = array<i32>} : memref<1x16x16xf32, #tpu.memory_space<vmem>>, vector<1x16x16xf32>,
    return
  }
  func.func @transform_0(%arg0: i32, %arg1: i32, %arg2: i32) -> (i32, i32, i32) {
    %c0_i32 = arith.constant 0 : i32
    %c0_i32_0 = arith.constant 0 : i32
    return %arg0, %arg1, %c0_i32 : i32, i32, i32
  }
  func.func @transform_1(%arg0: i32, %arg1: i32, %arg2: i32) -> (i32, i32, i32) {
    %c0_i32 = arith.constant 0 : i32
    %c0_i32_0 = arith.constant 0 : i32
    return %arg0, %arg2, %c0_i32 : i32, i32, i32
  }
  func.func @transform_2(%arg0: i32, %arg1: i32, %arg2: i32) -> (i32, i32, i32) {
    %c0_i32 = arith.constant 0 : i32
    return %arg0, %arg1, %arg2 : i32, i32, i32
  }
}

</mosaic_0001>

<bundles_post_ra>
// kernel: tpu_custom_call.1
= control target key start
LH: loop header
LB: loop body
LE: loop exit
PB: predicated region body
PF: predicated region fallthrough
CT: control target
= control target key end

     0   :  { %7 = vsyncpa [#allocation3], 0  ;;  %s803_s0 = inlined_call_operand.vmem [shape: f32[2,16,3], index: 0, kind: input, shape index: {}]   ;;  %s804_s1 = inlined_call_operand.vmem [shape: f32[2,16,3], index: 1, kind: input, shape index: {}]   ;;  %s805_s2 = inlined_call_operand.hbm [shape: f32[2,16,16], index: 2, kind: output, shape index: {}]  }
   0x1   :  { %9 = vsyncpa [#allocation3 + $0x1], 0  ;;  %s676_s9 = smov 0   ;;  %s678_s10 = smov 0  }
   0x2   :  { %s680_s11 = smov 0   ;;  %s682_s12 = smov 0  }
   0x3   :  { %s684_s13 = smov 0   ;;  %s686_s14 = smov 0  }
   0x4 LB: > { %s489_s15 = sadd.s32 4294967295, %s656_s14   ;;  %s490_s16 = sadd.s32 4294967294, %s656_s14   ;;  %s656_s14 = sphi %s686_s14, %s15_s14   ;;  %s652_s13 = sphi %s684_s13, %s812_s13   ;;  %s648_s12 = sphi %s682_s12, %s811_s12   ;;  %s644_s11 = sphi %s680_s11, %s810_s11   ;;  %s640_s10 = sphi %s678_s10, %s809_s10   ;;  %s636_s9 = sphi %s676_s9, %s808_s9  }
   0x5   : > { %s34_s17 = sadd.s32 1, %s652_s13  ;;  %s101_s18 = sadd.s32 1, %s644_s11 }
   0x6   : > { %p36_p0 = scmp.ge.s32.totalorder %s34_s17, 2  ;;  %p111_p1 = scmp.ne.s32.totalorder %s644_s11, %s640_s10 }
   0x7   : > { %p112_p2 = scmp.eq.s32.totalorder %s489_s15, 1  ;;  %p117_p3 = scmp.ne.s32.totalorder %s640_s10, %s636_s9 }
   0x8   : > { %s814_s17 = smov (%p36_p0, %s34_s17), 0  ;;  %p118_p5 = scmp.eq.s32.totalorder %s490_s16, 1 }
   0x9   : > { %p716_p4 = por %p112_p2, %p111_p1  ;;  %s94_s20 = ssub.s32 %s652_s13, %s814_s17 }
   0xa   : > { %p493_p6 = scmp.ge.s32.totalorder %s656_s14, 1  ;;  %p99_p7 = scmp.eq.s32.totalorder %s94_s20, 0 }
   0xb   : > { %p723_p8 = por %p118_p5, %p117_p3  ;;  %p162_p9 = scmp.lt.s32.totalorder %s656_s14, 3 }
   0xc   : > { %s729_s22 = scalar_select %p99_p7, %s644_s11, %s101_s18  }
   0xd   : > { %p163_p10 = pnand %p493_p6, %p162_p9 }
   0xe   : > { %p198_p11 = scmp.lt.s32.totalorder (!%p163_p10), %s648_s12, 1  ;;  %s194_s3 = sand.u32 (!%p163_p10), 1, %s640_s10  }
   0xf   : > { %166 = sbr.rel (%p163_p10) target bundleno = 309 (0x135), region = 28  ;;  %s494_s4 = sshll.u32 (!%p163_p10), %s194_s3, 4 }
  0x10   : > { %s196_s5 = scalar_lea.vmem (!%p163_p10), [#allocation2], %s494_s4  ;;  %s510_s7 = sshll.u32 (!%p163_p10), %s648_s12, 8 }
  0x11   : > { %s388_s6 = sshll.u32 (!%p163_p10), %s196_s5, 4  ;;  %s754_s16 = scalar_lea.hbm (!%p163_p10), %s805_s2, %s510_s7  ;;  %s756_s6 = int_to_ptr.vmem [resolvable:$true] %s388_s6 }
  0x12   : > { %s580_s18 = scalar_lea.vmem (!%p163_p10), %s756_s6, 256  ;;  %s658_s20 = smov (!%p163_p10), [#allocation2]  }
  0x13   : > { %p581_p12 = scmp.ne.s32.totalorder (!%p163_p10), %s756_s6, %s580_s18 }
  0x14   : > { %s199_s23 = scalar_select %p198_p11, %s648_s12, 1  ;;  %vm224_vm0 = vcmask 23552   ;;  %v362_v14 = vlaneseq  ;;  %vm368_vm1 = vcmask 130048  }
  0x15   : > { %s758_s12 = scalar_lea.sflag [#allocation3], %s194_s3  ;;  %p582_p13 = pnand %p581_p12, %p716_p4 }
  0x16   : > { %s508_s24 = sshll.u32 %s199_s23, 4  ;;  %v363_v17 = vshrl.u32 %v362_v14, 7  ;;  %s584_s23 = sshll.u32 %s658_s20, 4  ;;  %s585_s23 = int_to_ptr.vmem [resolvable:$false] %s584_s23 }
  0x17   : > { %s215_s27 = scalar_lea.vmem %s804_s1, %s508_s24  ;;  %s205_s30 = scalar_lea.vmem %s803_s0, %s508_s24 }
  0x18   : > { %v220_v0 = vld [vmem:[%s215_s27] sm:$0xff]  ;;  %v221_v1 = vld [vmem:[%s215_s27 + $0x8] sm:$0xff]  ;;  %v364_v21 = vsub.s32 0, %v363_v17  ;;  %p583_p0 = pneg %p582_p13  ;;  %s586_s24 = scalar_lea.vmem %s585_s23, 512 }
  0x19   : > { %v218_v2 = vld [vmem:[%s205_s30] sm:$0xff]  ;;  %v231_v3 = vmul.f32 %v220_v0, %v220_v0  ;;  %v232_v4 = vmul.f32 %v221_v1, %v221_v1  ;;  %515 = vmatprep.subr.msk.mxu0 %vm224_vm0, %v221_v1  ;;  %v219_v5 = vld [vmem:[%s205_s30 + $0x8] sm:$0xff]  ;;  %p587_p1 = scmp.lt.s32.totalorder %s756_s6, %s585_s23  ;;  %p588_p2 = scmp.lt.s32.totalorder %s586_s24, %s580_s18 }
  0x1a   : > { %v222_v6 = vmul.f32 %v218_v2, %v218_v2  ;;  %519 = vmatprep.mubr.msk.f32.mxu0 %vm224_vm0, %v218_v2  ;;  %516 = vmatpush3.xpose.msk.msra.mxu0 %vm224_vm0, %v221_v1  ;;  %v223_v7 = vmul.f32 %v219_v5, %v219_v5 }
  0x1b   : > { %v233_v8 = vsel %vm224_vm0, %v231_v3, 0.0  ;;  %517 = vmatprep.subr.msk.mxu0 %vm224_vm0, %v220_v0  ;;  %v236_v10 = vsel %vm224_vm0, %v232_v4, 0.0  ;;  %p589_p3 = por %p588_p2, %p587_p1 }
  0x1c   : > { %v225_v9 = vsel %vm224_vm0, %v222_v6, 0.0  ;;  %234 = vadd.xlane.f32.xlu0 %v233_v8  ;;  %v228_v11 = vsel %vm224_vm0, %v223_v7, 0.0 }
  0x1d   : > { %226 = vadd.xlane.f32.xlu1 %v225_v9  ;;  %p590_p5 = pnand %p589_p3, %p583_p0 }
  0x1e   : > { %518 = vmatpush3.xpose.msk.msra.mxu0 %vm224_vm0, %v220_v0 }
  0x20   : > { %237 = vadd.xlane.f32.xlu0 %v236_v10 }
  0x21   : > { %229 = vadd.xlane.f32.xlu1 %v228_v11  ;;  %520 = vmatmul.mubr.msk.f32.vlgmr.msra.gmra.mxu0 %vm224_vm0, %v219_v5 }
  0xa5   : > { %v235_v12 = vpop.xlane.xlu0 %234 }
  0xa6   : > { %330 = vxpose.xlu0.b32.start [1/2] (short) (narrow) %v235_v12, 8  ;;  %v227_v16 = vpop.xlane.xlu1 %226 }
  0xa9   : > { %v238_v13 = vpop.xlane.xlu0 %237 }
  0xaa   : > { %331 = vxpose.xlu0.b32.end [2/2] (short) (narrow) %v238_v13, 8  ;;  %v230_v22 = vpop.xlane.xlu1 %229 }
  0xe1   : > { %v521_v15 = vpop.f32.mrf.mxu0 }
  0xe2   : > { %v327_v19 = vmul.f32 2.0, %v521_v15 }
  0xe3   : > { %v317_v18 = vpop.f32.mrf.mxu0 }
  0xe4   : > { %v326_v20 = vmul.f32 2.0, %v317_v18  ;;  %v329_v25 = vsub.f32 %v327_v19, %v230_v22 }
  0xe6   : > { %v328_v24 = vsub.f32 %v326_v20, %v227_v16 }
 0x122   : > { %v346_v23 = vpop.trf.xlu0 }
 0x123   : > { %v365_v26 = vrot.slane %v346_v23, %v364_v21 }
 0x125   : > { %v366_v27 = vsub.f32 %v328_v24, %v365_v26  ;;  %v367_v28 = vsub.f32 %v329_v25, %v365_v26 }
 0x127   : > { %369 = vst.msk [vmem:[%s196_s5] sm:$0xff] %vm368_vm1, %v366_v27  ;;  %370 = vst.msk [vmem:[%s196_s5 + $0x8] sm:$0xff] %vm368_vm1, %v367_v28 }
 0x128   : > { %593 = shalt.err (!%p590_p5)
}
 0x129   : > { %s594_s25 = scalar_lea.hbm %s754_s16, 256  ;;  %s598_s28 = scalar_lea.hbm %s805_s2, 512 }
 0x12a   : > { %p595_p6 = scmp.ne.s32.totalorder %s754_s16, %s594_s25  ;;  %p599_p10 = scmp.lt.s32.totalorder %s754_s16, %s805_s2 }
 0x12b   : > { %p600_p11 = scmp.lt.s32.totalorder %s598_s28, %s594_s25 }
 0x12c   : > { %p596_p7 = pnand %p595_p6, %p716_p4 }
 0x12d   : > { %p601_p12 = por %p600_p11, %p599_p10 }
 0x12e   : > { %p597_p9 = pneg %p596_p7 }
 0x130   : > { %p602_p13 = pnand %p601_p12, %p597_p9 }
 0x132   : > { %605 = shalt.err (!%p602_p13)
}
 0x133   : > { %s659_s3 = smov 128   ;;  %s660_s4 = smov 8  }
 0x134   : > { %522 = dma.vmem_to_hbm [thread:$0]  (%p716_p4), %s756_s6, 256, %s754_s16, %s758_s12, %s659_s3, %s659_s3, %s660_s4  }
 0x135 PF: > { %p528_p0 = scmp.ge.s32.totalorder %s656_s14, 2  ;;  %s403_s5 = sand.u32 1, %s636_s9  }
 0x136   : > { %s404_s7 = scalar_lea.sflag [#allocation3], %s403_s5 }
 0x137   : > { %p525_p1 = pnand %p528_p0, %p723_p8 }
 0x139   : > { %p526_p2 = pneg %p525_p1 }
 0x13b   : > { %631 = dma.done.wait (%p526_p2), %s404_s7, 256  }
 0x13c   : > { %633 = vsyncadd (%p526_p2), %s404_s7, 4294967040  ;;  %s15_s14 = sadd.s32 1, %s656_s14   ;;  %s808_s9 = smov %s640_s10 }
 0x13d   : > { %p12_p3 = scmp.ge.s32.totalorder %s15_s14, 4   ;;  %s809_s10 = smov %s644_s11 }
 0x13e   : > { %s810_s11 = smov %s729_s22  ;;  %s811_s12 = smov %s652_s13 }
 0x13f   : > { %s812_s13 = smov %s814_s17  ;;  %14 = sbr.rel (!%p12_p3) target bundleno = 4 (0x4), region = 66 }
 0x144   :  { %409 = vsyncpa [#allocation3], 1 }
 0x145   :  { %411 = vsyncpa [#allocation3 + $0x1], 1 }

</bundles_post_ra>
